<compile_context>
chip_gen: v5e
topology: v5e:2x2
jax: 0.10.0
libtpu: 0.0.40
codegen_flags: <defaults>
</compile_context>

<pallas_src>
import functools

import jax
import jax.numpy as jnp
from jax import lax
from jax.experimental import pallas as pl
from jax.experimental.pallas import tpu as pltpu


# ---------------------------------------------------------------------------
# Stage 1: fused QKV projection (hoisted out of the attention reduction loop).
# One bf16 (block_t, d_in) @ (d_in, 3*d_out) matmul per (batch, token-tile);
# outputs are written per-head as (B, H, T, hd) so the attention kernel never
# transposes per kv step.
# ---------------------------------------------------------------------------
def _qkv_proj_kernel(x_ref, wqkv_ref, q_ref, k_ref, v_ref, *,
                     num_heads: int, head_dim: int, d_out: int):
    x = x_ref[...]                                                 # (bt, d_in)       bf16
    w = wqkv_ref[...]                                              # (d_in, 3*d_out)  bf16
    qkv = jnp.dot(x, w, preferred_element_type=jnp.float32)        # (bt, 3*d_out)    f32
    bt = x.shape[0]

    def heads(a):                                                  # (bt, d_out) -> (H, bt, hd)
        return a.reshape(bt, num_heads, head_dim).transpose(1, 0, 2)

    q_ref[...] = heads(qkv[:, :d_out]).astype(q_ref.dtype)         # Q already scaled via W_q
    k_ref[...] = heads(qkv[:, d_out:2 * d_out]).astype(k_ref.dtype)
    v_ref[...] = heads(qkv[:, 2 * d_out:]).astype(v_ref.dtype)


# ---------------------------------------------------------------------------
# Stage 2: flash attention over pre-projected (B, H, T, hd) Q/K/V with a fused
# bf16 output-projection epilogue.  grid = (batch, q-tile, kv-tile); kv is the
# reduction axis with online softmax state in VMEM scratch.
# ---------------------------------------------------------------------------
def _flash_attn_kernel(q_ref, k_ref, v_ref, wo_ref, bo_ref,        # inputs
                       o_ref,                                      # output
                       m_scr, l_scr, acc_scr,                      # scratch
                       *, block_q: int, block_kv: int, d_out: int):
    qi = pl.program_id(1)
    ki = pl.program_id(2)
    q_start = qi * block_q
    k_start = ki * block_kv
    # Last kv tile that intersects the causal triangle for this q tile.
    last_kv = (q_start + block_q - 1) // block_kv

    # ---- once per (batch, q-tile): reset online-softmax state.
    @pl.when(ki == 0)
    def _init():
        m_scr[...] = jnp.full(m_scr.shape, -jnp.inf, dtype=m_scr.dtype)
        l_scr[...] = jnp.zeros_like(l_scr)
        acc_scr[...] = jnp.zeros_like(acc_scr)

    # ---- causal tile skip: only tiles not entirely above the diagonal.
    @pl.when(k_start < q_start + block_q)
    def _attend():
        q = q_ref[...]                                             # (H, bq, hd) bf16 (pre-scaled)
        k = k_ref[...]                                             # (H, bk, hd) bf16
        v = v_ref[...]                                             # (H, bk, hd) bf16
        s = jnp.einsum("hqd,hkd->hqk", q, k,
                       preferred_element_type=jnp.float32)         # (H, bq, bk) f32

        # Per-tile causal mask (finite value: safe for padded/tiled rows).
        row = q_start + lax.broadcasted_iota(jnp.int32, (block_q, block_kv), 0)
        col = k_start + lax.broadcasted_iota(jnp.int32, (block_q, block_kv), 1)
        s = jnp.where((col <= row)[None, :, :], s, jnp.float32(-1e30))

        m_prev = m_scr[...]                                        # (H, bq)
        m_new = jnp.maximum(m_prev, jnp.max(s, axis=-1))
        alpha = jnp.exp(m_prev - m_new)
        p = jnp.exp(s - m_new[:, :, None])                         # (H, bq, bk) f32
        l_scr[...] = alpha * l_scr[...] + jnp.sum(p, axis=-1)
        acc_scr[...] = alpha[:, :, None] * acc_scr[...] + jnp.einsum(
            "hqk,hkd->hqd", p.astype(jnp.bfloat16), v,
            preferred_element_type=jnp.float32)
        m_scr[...] = m_new

    # ---- at the diagonal tile (last processed kv tile): normalize, merge
    #      heads, output projection + bias, store.
    @pl.when(ki == last_kv)
    def _finalize():
        inv_l = pl.reciprocal(l_scr[...], approx=True)             # (H, bq), EUP slot
        ctx = acc_scr[...] * inv_l[:, :, None]                     # (H, bq, hd) f32
        ctx = ctx.transpose(1, 0, 2).reshape(block_q, d_out)       # (bq, d_out)
        out = jnp.dot(ctx.astype(jnp.bfloat16), wo_ref[...],
                      preferred_element_type=jnp.float32) + bo_ref[...]
        o_ref[...] = out.astype(o_ref.dtype)


def multi_head_attention(x, wq, wk, wv, wo, bo, *, num_heads,
                         block_q=128, block_kv=128):
    """x: (B, T, d_in); wq/wk/wv: (d_in, d_out); wo: (d_out, d_out); bo: (1, d_out).

    Weights are the transposed nn.Linear weights (so kernel does x @ W == x @ W.T of torch).
    Causal mask, softmax(QK^T/sqrt(head_dim)) V, then out_proj.  Dropout = eval identity.
    """
    B, T, d_in = x.shape
    d_out = wq.shape[1]
    assert d_out % num_heads == 0, "d_out must be divisible by num_heads"
    head_dim = d_out // num_heads

    block_q = min(block_q, T)
    block_kv = min(block_kv, T)
    assert T % block_q == 0 and T % block_kv == 0, "T must be divisible by the tile sizes"
    n_q = T // block_q
    n_kv = T // block_kv

    scale = 1.0 / (head_dim ** 0.5)
    # bf16 operands for all MXU matmuls; fold 1/sqrt(head_dim) into W_q (exact);
    # fuse Q/K/V weights into a single (d_in, 3*d_out) matmul per token tile.
    x_bf = x.astype(jnp.bfloat16)
    wqkv = jnp.concatenate([wq * scale, wk, wv], axis=1).astype(jnp.bfloat16)
    wo_bf = wo.astype(jnp.bfloat16)
    bo_f32 = bo.astype(jnp.float32)

    # ---------------- Stage 1: projection ----------------
    qkv_shape = jax.ShapeDtypeStruct((B, num_heads, T, head_dim), jnp.bfloat16)
    proj_kernel = functools.partial(
        _qkv_proj_kernel, num_heads=num_heads, head_dim=head_dim, d_out=d_out)
    head_spec = pl.BlockSpec((pl.Squeezed(), num_heads, block_q, head_dim),
                             lambda b, ti: (b, 0, ti, 0))
    q, k, v = pl.pallas_call(
        proj_kernel,
        out_shape=(qkv_shape, qkv_shape, qkv_shape),
        grid_spec=pltpu.PrefetchScalarGridSpec(
            num_scalar_prefetch=0,
            grid=(B, n_q),
            in_specs=[
                pl.BlockSpec((pl.Squeezed(), block_q, d_in), lambda b, ti: (b, ti, 0)),
                pl.BlockSpec((d_in, 3 * d_out), lambda b, ti: (0, 0)),
            ],
            out_specs=(head_spec, head_spec, head_spec),
        ),
        compiler_params=pltpu.CompilerParams(
            dimension_semantics=("parallel", "parallel")),
    )(x_bf, wqkv)

    # ---------------- Stage 2: flash attention + out_proj ----------------
    def q_index(b, qi, ki):
        return (b, 0, qi, 0)

    def kv_index(b, qi, ki):
        # Clamp to the diagonal tile: skipped (fully-masked) kv steps keep the
        # same block index, so Pallas does not re-DMA them.
        last = (qi * block_q + block_q - 1) // block_kv
        return (b, 0, jnp.minimum(ki, last), 0)

    attn_kernel = functools.partial(
        _flash_attn_kernel, block_q=block_q, block_kv=block_kv, d_out=d_out)

    return pl.pallas_call(
        attn_kernel,
        out_shape=jax.ShapeDtypeStruct((B, T, d_out), x.dtype),
        grid_spec=pltpu.PrefetchScalarGridSpec(
            num_scalar_prefetch=0,
            grid=(B, n_q, n_kv),
            in_specs=[
                pl.BlockSpec((pl.Squeezed(), num_heads, block_q, head_dim), q_index),
                pl.BlockSpec((pl.Squeezed(), num_heads, block_kv, head_dim), kv_index),
                pl.BlockSpec((pl.Squeezed(), num_heads, block_kv, head_dim), kv_index),
                pl.BlockSpec((d_out, d_out), lambda b, qi, ki: (0, 0)),   # W_out (bf16)
                pl.BlockSpec((1, d_out), lambda b, qi, ki: (0, 0)),       # bias  (f32)
            ],
            out_specs=pl.BlockSpec((pl.Squeezed(), block_q, d_out),
                                   lambda b, qi, ki: (b, qi, 0)),
            scratch_shapes=[
                pltpu.VMEM((num_heads, block_q), jnp.float32),            # running max m
                pltpu.VMEM((num_heads, block_q), jnp.float32),            # running denom l
                pltpu.VMEM((num_heads, block_q, head_dim), jnp.float32),  # f32 accumulator
            ],
        ),
        compiler_params=pltpu.CompilerParams(
            dimension_semantics=("parallel", "parallel", "arbitrary"),
            vmem_limit_bytes=48 * 1024 * 1024,
        ),
    )(q, k, v, wo_bf, bo_f32)


def reference_mha(x, wq, wk, wv, wo, bo, *, num_heads):
    B, T, d_in = x.shape
    d_out = wq.shape[1]
    hd = d_out // num_heads
    q = (x @ wq).reshape(B, T, num_heads, hd).transpose(0, 2, 1, 3)
    k = (x @ wk).reshape(B, T, num_heads, hd).transpose(0, 2, 1, 3)
    v = (x @ wv).reshape(B, T, num_heads, hd).transpose(0, 2, 1, 3)
    s = jnp.einsum("bhqd,bhkd->bhqk", q, k) / (hd ** 0.5)
    mask = jnp.triu(jnp.ones((T, T), bool), 1)
    s = jnp.where(mask[None, None], -jnp.inf, s)
    p = jax.nn.softmax(s, axis=-1)
    ctx = jnp.einsum("bhqk,bhkd->bhqd", p, v).transpose(0, 2, 1, 3).reshape(B, T, d_out)
    return ctx @ wo + bo


if __name__ == "__main__":
    # Module hyperparameters (small, consistent with the forward pass)
    B, T = 2, 8          # batch, num_tokens (== context_length)
    d_in, d_out = 16, 32
    num_heads = 4        # head_dim = 8
    dropout = 0.0        # eval/inference semantics

    key = jax.random.PRNGKey(0)
    kx, kq, kk, kv, ko, kb = jax.random.split(key, 6)

    x = jax.random.normal(kx, (B, T, d_in), dtype=jnp.float32)
    # nn.Linear(d_in, d_out) weight is (d_out, d_in); store transposed as (d_in, d_out).
    wq = jax.random.normal(kq, (d_in, d_out), dtype=jnp.float32) * 0.1
    wk = jax.random.normal(kk, (d_in, d_out), dtype=jnp.float32) * 0.1
    wv = jax.random.normal(kv, (d_in, d_out), dtype=jnp.float32) * 0.1
    wo = jax.random.normal(ko, (d_out, d_out), dtype=jnp.float32) * 0.1
    bo = jax.random.normal(kb, (1, d_out), dtype=jnp.float32) * 0.1

    out = multi_head_attention(x, wq, wk, wv, wo, bo, num_heads=num_heads)
    out = jax.block_until_ready(out)

    ref = reference_mha(x, wq, wk, wv, wo, bo, num_heads=num_heads)
    assert out.shape == (B, T, d_out)
    # bf16 matmuls + approx reciprocal -> bf16-appropriate tolerance vs f32 reference.
    assert jnp.allclose(out, ref, atol=2e-2, rtol=2e-2), "mismatch vs reference"

    print("KERNEL_OK")
</pallas_src>

<mosaic_0001>
module attributes {stable_mosaic.version = 11 : i64} {
  func.func @_qkv_proj_kernel(%arg0: i32, %arg1: i32, %arg2: memref<1x8x16xbf16, #tpu.memory_space<vmem>>, %arg3: memref<16x96xbf16, #tpu.memory_space<vmem>>, %arg4: memref<1x4x8x8xbf16, #tpu.memory_space<vmem>>, %arg5: memref<1x4x8x8xbf16, #tpu.memory_space<vmem>>, %arg6: memref<1x4x8x8xbf16, #tpu.memory_space<vmem>>) attributes {dimension_semantics = [#tpu.dimension_semantics<parallel>, #tpu.dimension_semantics<parallel>], iteration_bounds = array<i64: 2, 1>, scalar_prefetch = 0 : i64, scratch_operands = 0 : i64, tpu.core_type = #tpu.core_type<tc>, window_params = [{transform_indices = @transform_0, window_bounds = array<i64: 1, 8, 16>}, {pipeline_mode = #tpu.pipeline_mode<synchronous>, transform_indices = @transform_1, window_bounds = array<i64: 16, 96>}, {transform_indices = @transform_2, window_bounds = array<i64: 1, 4, 8, 8>}, {transform_indices = @transform_3, window_bounds = array<i64: 1, 4, 8, 8>}, {transform_indices = @transform_4, window_bounds = array<i64: 1, 4, 8, 8>}]} {
    %c0 = arith.constant 0 : index
    %c0_0 = arith.constant 0 : index
    %c0_1 = arith.constant 0 : index
    %0 = vector.load %arg2[%c0, %c0_0, %c0_1] : memref<1x8x16xbf16, #tpu.memory_space<vmem>>, vector<1x8x16xbf16>
    %1 = vector.shape_cast %0 : vector<1x8x16xbf16> to vector<8x16xbf16>
    %c0_2 = arith.constant 0 : index
    %c0_3 = arith.constant 0 : index
    %2 = vector.load %arg3[%c0_2, %c0_3] : memref<16x96xbf16, #tpu.memory_space<vmem>>, vector<16x96xbf16>
    %cst = arith.constant dense<0.000000e+00> : vector<8x96xf32>
    %3 = tpu.matmul %1, %2, %cst {dimension_numbers = #tpu.dot_dimension_numbers<[1], [0], [0], [1], [0, 0, 1, 1], [], []>} : vector<8x16xbf16>, vector<16x96xbf16>, vector<8x96xf32> -> vector<8x96xf32>
    %4 = vector.extract_strided_slice %3 {offsets = [0, 0], sizes = [8, 32], strides = [1, 1]} : vector<8x96xf32> to vector<8x32xf32>
    %5 = vector.shape_cast %4 : vector<8x32xf32> to vector<8x4x8xf32>
    %6 = tpu.transpose %5, [1, 0, 2] : vector<8x4x8xf32> -> vector<4x8x8xf32>
    %7 = arith.truncf %6 : vector<4x8x8xf32> to vector<4x8x8xbf16>
    %c0_4 = arith.constant 0 : index
    %c0_5 = arith.constant 0 : index
    %c0_6 = arith.constant 0 : index
    %c0_7 = arith.constant 0 : index
    %8 = vector.load %arg4[%c0_4, %c0_5, %c0_6, %c0_7] : memref<1x4x8x8xbf16, #tpu.memory_space<vmem>>, vector<1x4x8x8xbf16>
    %9 = vector.shape_cast %8 : vector<1x4x8x8xbf16> to vector<4x8x8xbf16>
    %10 = vector.shape_cast %7 : vector<4x8x8xbf16> to vector<1x4x8x8xbf16>
    tpu.vector_store %arg4[%c0_4, %c0_5, %c0_6, %c0_7], %10 {strides = array<i32>} : memref<1x4x8x8xbf16, #tpu.memory_space<vmem>>, vector<1x4x8x8xbf16>,
    %11 = vector.extract_strided_slice %3 {offsets = [0, 32], sizes = [8, 32], strides = [1, 1]} : vector<8x96xf32> to vector<8x32xf32>
    %12 = vector.shape_cast %11 : vector<8x32xf32> to vector<8x4x8xf32>
    %13 = tpu.transpose %12, [1, 0, 2] : vector<8x4x8xf32> -> vector<4x8x8xf32>
    %14 = arith.truncf %13 : vector<4x8x8xf32> to vector<4x8x8xbf16>
    %c0_8 = arith.constant 0 : index
    %c0_9 = arith.constant 0 : index
    %c0_10 = arith.constant 0 : index
    %c0_11 = arith.constant 0 : index
    %15 = vector.load %arg5[%c0_8, %c0_9, %c0_10, %c0_11] : memref<1x4x8x8xbf16, #tpu.memory_space<vmem>>, vector<1x4x8x8xbf16>
    %16 = vector.shape_cast %15 : vector<1x4x8x8xbf16> to vector<4x8x8xbf16>
    %17 = vector.shape_cast %14 : vector<4x8x8xbf16> to vector<1x4x8x8xbf16>
    tpu.vector_store %arg5[%c0_8, %c0_9, %c0_10, %c0_11], %17 {strides = array<i32>} : memref<1x4x8x8xbf16, #tpu.memory_space<vmem>>, vector<1x4x8x8xbf16>,
    %18 = vector.extract_strided_slice %3 {offsets = [0, 64], sizes = [8, 32], strides = [1, 1]} : vector<8x96xf32> to vector<8x32xf32>
    %19 = vector.shape_cast %18 : vector<8x32xf32> to vector<8x4x8xf32>
    %20 = tpu.transpose %19, [1, 0, 2] : vector<8x4x8xf32> -> vector<4x8x8xf32>
    %21 = arith.truncf %20 : vector<4x8x8xf32> to vector<4x8x8xbf16>
    %c0_12 = arith.constant 0 : index
    %c0_13 = arith.constant 0 : index
    %c0_14 = arith.constant 0 : index
    %c0_15 = arith.constant 0 : index
    %22 = vector.load %arg6[%c0_12, %c0_13, %c0_14, %c0_15] : memref<1x4x8x8xbf16, #tpu.memory_space<vmem>>, vector<1x4x8x8xbf16>
    %23 = vector.shape_cast %22 : vector<1x4x8x8xbf16> to vector<4x8x8xbf16>
    %24 = vector.shape_cast %21 : vector<4x8x8xbf16> to vector<1x4x8x8xbf16>
    tpu.vector_store %arg6[%c0_12, %c0_13, %c0_14, %c0_15], %24 {strides = array<i32>} : memref<1x4x8x8xbf16, #tpu.memory_space<vmem>>, vector<1x4x8x8xbf16>,
    return
  }
  func.func @transform_0(%arg0: i32, %arg1: i32) -> (i32, i32, i32) {
    %c0_i32 = arith.constant 0 : i32
    %c0_i32_0 = arith.constant 0 : i32
    return %arg0, %arg1, %c0_i32 : i32, i32, i32
  }
  func.func @transform_1(%arg0: i32, %arg1: i32) -> (i32, i32) {
    %c0_i32 = arith.constant 0 : i32
    %c0_i32_0 = arith.constant 0 : i32
    %c0_i32_1 = arith.constant 0 : i32
    return %c0_i32, %c0_i32_0 : i32, i32
  }
  func.func @transform_2(%arg0: i32, %arg1: i32) -> (i32, i32, i32, i32) {
    %c0_i32 = arith.constant 0 : i32
    %c0_i32_0 = arith.constant 0 : i32
    %c0_i32_1 = arith.constant 0 : i32
    return %arg0, %c0_i32, %arg1, %c0_i32_0 : i32, i32, i32, i32
  }
  func.func @transform_3(%arg0: i32, %arg1: i32) -> (i32, i32, i32, i32) {
    %c0_i32 = arith.constant 0 : i32
    %c0_i32_0 = arith.constant 0 : i32
    %c0_i32_1 = arith.constant 0 : i32
    return %arg0, %c0_i32, %arg1, %c0_i32_0 : i32, i32, i32, i32
  }
  func.func @transform_4(%arg0: i32, %arg1: i32) -> (i32, i32, i32, i32) {
    %c0_i32 = arith.constant 0 : i32
    %c0_i32_0 = arith.constant 0 : i32
    %c0_i32_1 = arith.constant 0 : i32
    return %arg0, %c0_i32, %arg1, %c0_i32_0 : i32, i32, i32, i32
  }
}

</mosaic_0001>

<bundles_post_ra>
// kernel: tpu_custom_call.1
= control target key start
LH: loop header
LB: loop body
LE: loop exit
PB: predicated region body
PF: predicated region fallthrough
CT: control target
= control target key end

     0   :  { %s1646_s0 = inlined_call_operand.hbm [shape: bf16[2,8,16], index: 0, kind: input, shape index: {}]   ;;  %s1647_s1 = inlined_call_operand.hbm [shape: bf16[16,96], index: 1, kind: input, shape index: {}]   ;;  %s1648_s2 = inlined_call_operand.hbm [shape: bf16[2,4,8,8], index: 2, kind: output, shape index: {0}]   ;;  %s1649_s3 = inlined_call_operand.hbm [shape: bf16[2,4,8,8], index: 3, kind: output, shape index: {1}]   ;;  %s1650_s4 = inlined_call_operand.hbm [shape: bf16[2,4,8,8], index: 4, kind: output, shape index: {2}]  }
   0x1   :  { %1654 = sst [smem:[#allocation15_spill]] %s1646_s0 }
   0x2   :  { %10 = vsyncpa [#allocation3], 0 }
   0x3   :  { %12 = vsyncpa [#allocation3 + $0x1], 0 }
   0x4   :  { %13 = vsyncpa [#allocation6], 0 }
   0x5   :  { %14 = vsyncpa [#allocation4], 0 }
   0x6   :  { %16 = vsyncpa [#allocation4 + $0x1], 0 }
   0x7   :  { %17 = vsyncpa [#allocation9], 0 }
   0x8   :  { %19 = vsyncpa [#allocation9 + $0x1], 0  ;;  %s1302_s15 = smov 0   ;;  %s1304_s16 = smov 0  }
   0x9   :  { %s1306_s17 = smov 0   ;;  %s1308_s18 = smov 0  }
   0xa   :  { %s1310_s19 = smov 0   ;;  %s1312_s20 = smov 0  }
   0xb LB: > { %s1333_s21 = sadd.s32 4294967295, %s1264_s20   ;;  %p914_p0 = scmp.ge.s32.totalorder %s1264_s20, 1  ;;  %s1264_s20 = sphi %s1312_s20, %s25_s20   ;;  %s1260_s19 = sphi %s1310_s19, %s1667_s19   ;;  %s1256_s18 = sphi %s1308_s18, %s1666_s18   ;;  %s1252_s17 = sphi %s1306_s17, %s1665_s17   ;;  %s1248_s16 = sphi %s1304_s16, %s1664_s16   ;;  %s1244_s15 = sphi %s1302_s15, %s1663_s15  }
   0xc   : > { %p60_p1 = scmp.eq.s32.totalorder %s1333_s21, 0  ;;  %p175_p2 = scmp.lt.s32.totalorder %s1264_s20, 3 }
   0xd   : > { %s186_s24 = sshll.u32 %s1647_s1, 4  ;;  %s1266_s26 = smov [#allocation5]   ;;  %s187_s24 = int_to_ptr.hbm [resolvable:$true] %s186_s24 }
   0xe   : > { %p1341_p3 = pnand %p914_p0, %p175_p2  ;;  %s188_s27 = sshll.u32 %s1266_s26, 4  ;;  %s189_s27 = int_to_ptr.vmem [resolvable:$true] %s188_s27 }
   0xf   : > { %p916_p6 = scmp.ge.s32.totalorder %s1264_s20, 2  ;;  %s1267_s28 = smov 64  }
  0x10   : > { %p957_p4 = pneg %p1341_p3  ;;  %s1268_s29 = smov 4  }
  0x11   : > { %s1651_s30 = sadd.s32 4294967294, %s1264_s20   ;;  %s37_s5 = sadd.s32 1, %s1260_s19 }
  0x12   : > { %p958_p5 = pnand %p957_p4, %p60_p1  ;;  %s46_s6 = sadd.s32 1, %s1252_s17 }
  0x13   : > { %p39_p7 = scmp.ge.s32.totalorder %s37_s5, 2  ;;  %p53_p8 = scmp.ne.s32.totalorder %s1252_s17, %s1248_s16 }
  0x14   : > { %960 = dma.hbm_to_vmem [thread:$0]  (!%p958_p5), %s187_s24, 128, %s189_s27, [#allocation6], %s1267_s28, %s1267_s28, %s1268_s29  }
  0x15   : > { %p54_p9 = scmp.eq.s32.totalorder %s1264_s20, 0  ;;  %p59_p10 = scmp.ne.s32.totalorder %s1248_s16, %s1244_s15 }
  0x16   : > { %s1669_s5 = smov (%p39_p7, %s37_s5), 0  ;;  %p106_p13 = scmp.eq.s32.totalorder %s1333_s21, 1 }
  0x17   : > { %p1360_p11 = por %p54_p9, %p53_p8  ;;  %p1366_p12 = por %p60_p1, %p59_p10 }
  0x18   : > { %s41_s9 = ssub.s32 %s1260_s19, %s1669_s5  ;;  %p112_p2 = scmp.eq.s32.totalorder %s1651_s30, 1 }
  0x19   : > { %p44_p0 = scmp.eq.s32.totalorder %s41_s9, 0  ;;  %p1375_p4 = por %p106_p13, %p53_p8 }
  0x1a   : > { %p976_p5 = scmp.lt.s32.totalorder %s1264_s20, 2  ;;  %p1383_p7 = por %p112_p2, %p59_p10 }
  0x1b   : > { %s1381_s11 = scalar_select %p44_p0, %s1252_s17, %s46_s6  }
  0x1c   : > { %s202_s13 = sand.u32 1, %s1252_s17   ;;  %s918_s22 = sshll.u32 %s1260_s19, 2 }
  0x1d   : > { %s917_s14 = sshll.u32 %s202_s13, 2  ;;  %s1660_s0 = sld [smem:[#allocation15_spill]] }
  0x1e   : > { %s206_s27 = scalar_lea.vmem [#allocation2], %s917_s14  ;;  %p962_p8 = pnand %p976_p5, %p1360_p11 }
  0x1f   : > { %s215_s28 = sshll.u32 %s206_s27, 4  ;;  %s203_s6 = scalar_lea.sflag [#allocation3], %s202_s13  ;;  %s216_s28 = int_to_ptr.vmem [resolvable:$true] %s215_s28 }
  0x20   : > { %s1397_s9 = sand.u32 (!%p1341_p3), 1, %s1248_s16  }
  0x21   : > { %224 = sbr.rel (%p1341_p3) target bundleno = 451 (0x1c3), region = 28  ;;  %s920_s23 = sshll.u32 (!%p1341_p3), %s1397_s9, 2 }
  0x22   : > { %s230_s14 = scalar_lea.vmem (!%p1341_p3), [#allocation2], %s920_s23 }
  0x23   : > { %s211_s26 = scalar_lea.hbm %s1660_s0, %s918_s22  ;;  %s227_s22 = scalar_lea.sflag (!%p1341_p3), [#allocation3], %s1397_s9 }
  0x24   : > { %s213_s29 = sshll.u32 %s211_s26, 4  ;;  %s214_s29 = int_to_ptr.hbm [resolvable:$true] %s213_s29 }
  0x25   : > { %964 = dma.hbm_to_vmem [thread:$0]  (!%p962_p8), %s214_s29, 64, %s216_s28, %s203_s6  }
  0x26   : > { %1227 = dma.done.wait (%p1366_p12), %s227_s22, 64  }
  0x27   : > { %1229 = vsyncadd (%p1366_p12), %s227_s22, 4294967232 }
  0x28   : > { %1231 = dma.done.wait (%p60_p1), [#allocation6], 128  }
  0x29   : > { %1233 = vsyncadd (%p60_p1), [#allocation6], 4294967168  ;;  %v941_v0 = vld [vmem:[#allocation5] sm:$0xff]  ;;  %v272_v1 = vld [vmem:[%s230_s14] sm:$0xf]  ;;  %vm281_vm0 = vcmask 130048  }
  0x2a   : > { %292 = vmatpush.bf16.msra.mxu0 %v941_v0  ;;  %s1269_s25 = smov 104   ;;  %s1270_s7 = smov 112   ;;  %v1272_v4 = vmov 1983009808   ;;  %vm309_vm1 = vcmask 1047556   ;;  %vm423_vm2 = vcmask 60416  }
  0x2b   : > { %s1271_s13 = smov 120   ;;  %v314_v5 = vunpack.c.l.s4 %v1272_v4  ;;  %s1652_s8 = smov 64   ;;  %v1275_v13 = vmov 1934713408  }
  0x2c   : > { %s1274_s24 = smov 96   ;;  %v338_v14 = vunpack.c.l.s4 %v1275_v13  ;;  %s1448_s26 = sshll.u32 %s1397_s9, 4 }
  0x2d   : > { %929 = vmatmul.msk.bf16.vlgmr.msra.gmra.mxu0 %vm281_vm0, %v272_v1  ;;  %v1411_v12 = vunpack.c.0.s8 %v314_v5  ;;  %s256_s27 = scalar_lea.vmem [#allocation7], %s1448_s26  ;;  %s1464_s28 = sshll.u32 %s1256_s18, 4 }
  0x2e   : > { %v1416_v19 = vunpack.c.0.s8 %v338_v14  ;;  %s711_s23 = scalar_lea.hbm %s1648_s2, %s1464_s28  ;;  %s712_s22 = sshll.u32 %s256_s27, 4  ;;  %s713_s22 = int_to_ptr.vmem [resolvable:$true] %s712_s22 }
  0x2f   : > { %s714_s14 = sshll.u32 %s711_s23, 4  ;;  %s1138_s30 = scalar_lea.hbm %s1648_s2, 32  ;;  %s715_s14 = int_to_ptr.hbm [resolvable:$true] %s714_s14 }
  0xaa   : > { %v294_v2 = vpop.f32.mrf.mxu0 }
  0xab   : > { %305 = vrot.lane.b32.xlu1 %v294_v2, %s1269_s25  ;;  %302 = vrot.lane.b32.xlu0 %v294_v2, %s1270_s7  ;;  %v311_v10 = vrot.slane %v294_v2, 4  ;;  %s689_s25 = scalar_lea.sflag [#allocation4], %s1397_s9  ;;  %s1132_s7 = sshra.s32 %s715_s14, 4  ;;  %s1133_s7 = int_to_ptr.hbm [resolvable:$true] %s1132_s7 }
  0xac   : > { %p1139_p10 = scmp.lt.s32.totalorder %s1133_s7, %s1648_s2 }
  0xb2   : > { %v296_v3 = vpop.f32.mrf.mxu0 }
  0xb3   : > { %299 = vrot.lane.b32.xlu0 %v294_v2, %s1271_s13  ;;  %s1134_s13 = scalar_lea.hbm %s1133_s7, 16 }
  0xb4   : > { %p1135_p1 = scmp.ne.s32.totalorder %s1133_s7, %s1134_s13  ;;  %p1140_p11 = scmp.lt.s32.totalorder %s1138_s30, %s1134_s13 }
  0xb6   : > { %p1136_p3 = pnand %p1135_p1, %p1375_p4  ;;  %p1141_p12 = por %p1140_p11, %p1139_p10 }
  0xb8   : > { %p1137_p9 = pneg %p1136_p3 }
  0xba   : > { %p1142_p13 = pnand %p1141_p12, %p1137_p9 }
 0x11d   : > { %v303_v6 = vpop.permute.xlu0 %302  ;;  %v306_v11 = vpop.permute.xlu1 %305 }
 0x11e   : > { %v308_v7 = vrot.slane %v303_v6, 4  ;;  %v1043_v8 = vpack.i.bf16 %v303_v6, %v294_v2  ;;  %v312_v15 = vsel %vm309_vm1, %v303_v6, %v311_v10  ;;  %v321_v17 = vrot.slane %v306_v11, 4 }
 0x11f   : > { %v320_v18 = vperm.slane %v312_v15, %v1411_v12 }
 0x120   : > { %v310_v9 = vsel %vm309_vm1, %v308_v7, %v294_v2  ;;  %1044 = vrot.lane.b32.xlu2 %v1043_v8, %s1652_s8  ;;  %1039 = vrot.lane.b32.xlu1 %v1043_v8, %s1274_s24 }
 0x121   : > { %v316_v16 = vperm.slane %v310_v9, %v1411_v12  ;;  %v347_v27 = vrot.slane %v320_v18, 4 }
 0x123   : > { %v335_v24 = vrot.slane %v316_v16, 4 }
 0x125   : > { %v300_v20 = vpop.permute.xlu0 %299 }
 0x126   : > { %v322_v21 = vsel %vm309_vm1, %v321_v17, %v300_v20  ;;  %v323_v22 = vrot.slane %v300_v20, 4  ;;  %v1053_v23 = vpack.i.bf16 %v306_v11, %v300_v20 }
 0x127   : > { %v328_v25 = vperm.slane %v322_v21, %v1411_v12 }
 0x128   : > { %v324_v26 = vsel %vm309_vm1, %v306_v11, %v323_v22  ;;  %1054 = vrot.lane.b32.xlu0 %v1053_v23, %s1652_s8  ;;  %1049 = vrot.lane.b32.xlu2 %v1053_v23, %s1274_s24 }
 0x129   : > { %v332_v28 = vperm.slane %v324_v26, %v1411_v12  ;;  %v333_v29 = vrot.slane %v328_v25, 4  ;;  %v336_v30 = vsel %vm309_vm1, %v328_v25, %v335_v24 }
 0x12a   : > { %v344_v31 = vperm.slane %v336_v30, %v1416_v19 }
 0x12b   : > { %v334_v32 = vsel %vm309_vm1, %v333_v29, %v316_v16  ;;  %v345_v33 = vrot.slane %v332_v28, 4  ;;  %v348_v34 = vsel %vm309_vm1, %v332_v28, %v347_v27 }
 0x12c   : > { %v340_v35 = vperm.slane %v334_v32, %v1416_v19  ;;  %v356_v36 = vperm.slane %v348_v34, %v1416_v19  ;;  %v359_v37 = vrot.slane %v344_v31, 4 }
 0x12d   : > { %v346_v38 = vsel %vm309_vm1, %v345_v33, %v320_v18 }
 0x12e   : > { %v352_v39 = vperm.slane %v346_v38, %v1416_v19  ;;  %v357_v40 = vrot.slane %v340_v35, 4  ;;  %v360_v41 = vsel %vm309_vm1, 0.0, %v359_v37  ;;  %v363_v42 = vrot.slane %v356_v36, 4 }
 0x12f   : > { %v365_v43 = vsel %vm309_vm1, %v359_v37, %v340_v35  ;;  %v370_v44 = vrot.slane %v360_v41, 4 }
 0x130   : > { %v358_v45 = vsel %vm309_vm1, 0.0, %v357_v40  ;;  %v361_v46 = vrot.slane %v352_v39, 4  ;;  %v364_v47 = vsel %vm309_vm1, 0.0, %v363_v42  ;;  %v369_v48 = vperm.slane %v365_v43, %v1411_v12 }
 0x131   : > { %v371_v49 = vsel %vm309_vm1, %v370_v44, %v358_v45  ;;  %v376_v50 = vsel %vm309_vm1, %v363_v42, %v352_v39  ;;  %v381_v51 = vrot.slane %v364_v47, 4 }
 0x132   : > { %v362_v52 = vsel %vm309_vm1, 0.0, %v361_v46  ;;  %v375_v53 = vperm.slane %v371_v49, %v1411_v12  ;;  %v380_v54 = vperm.slane %v376_v50, %v1411_v12  ;;  %v389_v55 = vrot.slane %v369_v48, 4 }
 0x133   : > { %v382_v56 = vsel %vm309_vm1, %v381_v51, %v362_v52 }
 0x134   : > { %v386_v57 = vperm.slane %v382_v56, %v1411_v12  ;;  %v387_v58 = vrot.slane %v375_v53, 4  ;;  %v390_v59 = vsel %vm309_vm1, %v375_v53, %v389_v55  ;;  %v401_v60 = vrot.slane %v380_v54, 4 }
 0x135   : > { %v398_v61 = vperm.slane %v390_v59, %v1416_v19 }
 0x136   : > { %v388_v62 = vsel %vm309_vm1, %v387_v58, %v369_v48  ;;  %v399_v63 = vrot.slane %v386_v57, 4  ;;  %v402_v0 = vsel %vm309_vm1, %v386_v57, %v401_v60 }
 0x137   : > { %v394_v1 = vperm.slane %v388_v62, %v1416_v19  ;;  %v410_v2 = vperm.slane %v402_v0, %v1416_v19  ;;  %v417_v3 = vrot.slane %v398_v61, 4 }
 0x138   : > { %v400_v4 = vsel %vm309_vm1, %v399_v63, %v380_v54 }
 0x139   : > { %v406_v5 = vperm.slane %v400_v4, %v1416_v19  ;;  %v413_v6 = vrot.slane %v394_v1, 4  ;;  %v415_v7 = vrot.slane %v410_v2, 4  ;;  %v418_v8 = vsel %vm309_vm1, %v410_v2, %v417_v3 }
 0x13a   : > { %v422_v9 = vpack.c.bf16 %v418_v8, %v418_v8 }
 0x13b   : > { %v411_v10 = vrot.slane %v406_v5, 4  ;;  %v414_v11 = vsel %vm309_vm1, %v406_v5, %v413_v6  ;;  %v416_v13 = vsel %vm309_vm1, %v415_v7, %v398_v61 }
 0x13c   : > { %v420_v14 = vpack.c.bf16 %v414_v11, %v414_v11  ;;  %v421_v15 = vpack.c.bf16 %v416_v13, %v416_v13  ;;  %427 = vst.msk [vmem:[%s256_s27 + $0xc] sm:$0xf] %vm423_vm2, %v422_v9 }
 0x13d   : > { %v412_v16 = vsel %vm309_vm1, %v411_v10, %v394_v1 }
 0x13e   : > { %v419_v17 = vpack.c.bf16 %v412_v16, %v412_v16  ;;  %425 = vst.msk [vmem:[%s256_s27 + $0x4] sm:$0xf] %vm423_vm2, %v420_v14 }
 0x13f   : > { %426 = vst.msk [vmem:[%s256_s27 + $0x8] sm:$0xf] %vm423_vm2, %v421_v15 }
 0x140   : > { %424 = vst.msk [vmem:[%s256_s27] sm:$0xf] %vm423_vm2, %v419_v17 }
 0x141   : > { %1145 = shalt.err (!%p1142_p13)
}
 0x142   : > { %s1276_s9 = smov 4   ;;  %s1661_s27 = smov 64  }
 0x143   : > { %951 = dma.vmem_to_hbm [thread:$0]  (%p1375_p4), %s713_s22, 256, %s715_s14, %s689_s25, %s1661_s27, %s1661_s27, %s1276_s9  }
 0x144   : > { %s729_s8 = scalar_lea.hbm %s1649_s3, %s1464_s28  ;;  %s693_s29 = sand.u32 1, %s1333_s21  }
 0x145   : > { %s263_s6 = scalar_lea.vmem [#allocation8], %s1448_s26  ;;  %s1545_s22 = sshll.u32 %s729_s8, 4  ;;  %s733_s22 = int_to_ptr.hbm [resolvable:$true] %s1545_s22 }
 0x146   : > { %s730_s23 = sshll.u32 %s263_s6, 4  ;;  %s1566_s14 = scalar_lea.sflag [#allocation9], %s693_s29  ;;  %s731_s23 = int_to_ptr.vmem [resolvable:$true] %s730_s23 }
 0x147   : > { %s1160_s25 = sshra.s32 %s733_s22, 4  ;;  %s1166_s18 = scalar_lea.hbm %s1649_s3, 32  ;;  %s1161_s25 = int_to_ptr.hbm [resolvable:$true] %s1160_s25 }
 0x148   : > { %s1162_s7 = scalar_lea.hbm %s1161_s25, 16  ;;  %p1167_p8 = scmp.lt.s32.totalorder %s1161_s25, %s1649_s3 }
 0x149   : > { %p1163_p0 = scmp.ne.s32.totalorder %s1161_s25, %s1162_s7  ;;  %p1168_p1 = scmp.lt.s32.totalorder %s1166_s18, %s1162_s7 }
 0x14b   : > { %p1164_p2 = pnand %p1163_p0, %p1375_p4  ;;  %p1169_p3 = por %p1168_p1, %p1167_p8 }
 0x14d   : > { %p1165_p5 = pneg %p1164_p2 }
 0x14f   : > { %p1170_p9 = pnand %p1169_p3, %p1165_p5 }
 0x17a   : > { %v1045_v18 = vpop.permute.xlu2 %1044 }
 0x17b   : > { %v1047_v25 = vunpack.i.h.bf16 %v1045_v18  ;;  %v1046_v26 = vunpack.i.l.bf16 %v1045_v18 }
 0x17d   : > { %v570_v34 = vrot.slane %v1047_v25, 4  ;;  %v572_v35 = vrot.slane %v1046_v26, 4 }
 0x17f   : > { %v571_v44 = vsel %vm309_vm1, %v570_v34, %v1046_v26  ;;  %v573_v45 = vsel %vm309_vm1, %v1047_v25, %v572_v35 }
 0x180   : > { %v577_v55 = vperm.slane %v571_v44, %v1411_v12  ;;  %v581_v56 = vperm.slane %v573_v45, %v1411_v12 }
 0x182   : > { %v1050_v20 = vpop.permute.xlu2 %1049  ;;  %v596_v3 = vrot.slane %v577_v55, 4  ;;  %v608_v4 = vrot.slane %v581_v56, 4 }
 0x183   : > { %v1052_v21 = vunpack.i.h.bf16 %v1050_v20  ;;  %v1051_v22 = vunpack.i.l.bf16 %v1050_v20 }
 0x185   : > { %v452_v23 = vrot.slane %v1052_v21, 4  ;;  %v454_v24 = vrot.slane %v1051_v22, 4 }
 0x187   : > { %v453_v27 = vsel %vm309_vm1, %v452_v23, %v1051_v22  ;;  %v455_v28 = vsel %vm309_vm1, %v1052_v21, %v454_v24 }
 0x188   : > { %v459_v32 = vperm.slane %v453_v27, %v1411_v12  ;;  %v463_v33 = vperm.slane %v455_v28, %v1411_v12 }
 0x18a   : > { %v464_v40 = vrot.slane %v459_v32, 4  ;;  %v476_v41 = vrot.slane %v463_v33, 4 }
 0x192   : > { %v1040_v29 = vpop.permute.xlu1 %1039 }
 0x193   : > { %v1042_v30 = vunpack.i.h.bf16 %v1040_v29  ;;  %v1041_v31 = vunpack.i.l.bf16 %v1040_v29 }
 0x195   : > { %v440_v36 = vrot.slane %v1042_v30, 4  ;;  %v442_v37 = vrot.slane %v1041_v31, 4 }
 0x197   : > { %v441_v38 = vsel %vm309_vm1, %v440_v36, %v1041_v31  ;;  %v443_v39 = vsel %vm309_vm1, %v1042_v30, %v442_v37 }
 0x198   : > { %v447_v42 = vperm.slane %v441_v38, %v1411_v12  ;;  %v451_v43 = vperm.slane %v443_v39, %v1411_v12 }
 0x19a   : > { %v1055_v46 = vpop.permute.xlu0 %1054  ;;  %v465_v47 = vsel %vm309_vm1, %v464_v40, %v447_v42  ;;  %v466_v48 = vrot.slane %v447_v42, 4  ;;  %v477_v49 = vsel %vm309_vm1, %v476_v41, %v451_v43  ;;  %v478_v50 = vrot.slane %v451_v43, 4 }
 0x19b   : > { %v471_v51 = vperm.slane %v465_v47, %v1416_v19  ;;  %v483_v52 = vperm.slane %v477_v49, %v1416_v19  ;;  %v1057_v53 = vunpack.i.h.bf16 %v1055_v46  ;;  %v1056_v54 = vunpack.i.l.bf16 %v1055_v46 }
 0x19c   : > { %v467_v57 = vsel %vm309_vm1, %v459_v32, %v466_v48  ;;  %v479_v58 = vsel %vm309_vm1, %v463_v33, %v478_v50 }
 0x19d   : > { %v475_v59 = vperm.slane %v467_v57, %v1416_v19  ;;  %v487_v60 = vperm.slane %v479_v58, %v1416_v19  ;;  %v582_v61 = vrot.slane %v1057_v53, 4  ;;  %v584_v62 = vrot.slane %v1056_v54, 4 }
 0x19e   : > { %v488_v63 = vrot.slane %v471_v51, 4  ;;  %v492_v1 = vrot.slane %v483_v52, 4 }
 0x19f   : > { %v490_v0 = vrot.slane %v475_v59, 4  ;;  %v494_v2 = vrot.slane %v487_v60, 4  ;;  %v583_v5 = vsel %vm309_vm1, %v582_v61, %v1056_v54  ;;  %v585_v6 = vsel %vm309_vm1, %v1057_v53, %v584_v62 }
 0x1a0   : > { %v489_v16 = vsel %vm309_vm1, 0.0, %v488_v63  ;;  %v493_v17 = vsel %vm309_vm1, 0.0, %v492_v1  ;;  %v589_v18 = vperm.slane %v583_v5, %v1411_v12  ;;  %v593_v20 = vperm.slane %v585_v6, %v1411_v12 }
 0x1a1   : > { %v491_v7 = vsel %vm309_vm1, 0.0, %v490_v0  ;;  %v495_v8 = vsel %vm309_vm1, 0.0, %v494_v2  ;;  %v496_v9 = vsel %vm309_vm1, %v490_v0, %v471_v51  ;;  %v507_v10 = vsel %vm309_vm1, %v494_v2, %v483_v52 }
 0x1a2   : > { %v500_v11 = vperm.slane %v496_v9, %v1411_v12  ;;  %v501_v13 = vrot.slane %v491_v7, 4  ;;  %v511_v14 = vperm.slane %v507_v10, %v1411_v12  ;;  %v512_v15 = vrot.slane %v495_v8, 4 }
 0x1a3   : > { %v594_v27 = vrot.slane %v589_v18, 4  ;;  %v597_v28 = vsel %vm309_vm1, %v589_v18, %v596_v3  ;;  %v606_v30 = vrot.slane %v593_v20, 4  ;;  %v609_v31 = vsel %vm309_vm1, %v593_v20, %v608_v4 }
 0x1a4   : > { %v502_v21 = vsel %vm309_vm1, %v501_v13, %v489_v16  ;;  %v513_v22 = vsel %vm309_vm1, %v512_v15, %v493_v17  ;;  %v520_v23 = vrot.slane %v500_v11, 4  ;;  %v532_v24 = vrot.slane %v511_v14, 4 }
 0x1a5   : > { %v506_v25 = vperm.slane %v502_v21, %v1411_v12  ;;  %v517_v26 = vperm.slane %v513_v22, %v1411_v12  ;;  %v605_v29 = vperm.slane %v597_v28, %v1416_v19  ;;  %v595_v38 = vsel %vm309_vm1, %v594_v27, %v577_v55 }
 0x1a6   : > { %v607_v39 = vsel %vm309_vm1, %v606_v30, %v581_v56  ;;  %v601_v42 = vperm.slane %v595_v38, %v1416_v19  ;;  %v617_v48 = vperm.slane %v609_v31, %v1416_v19 }
 0x1a7   : > { %v518_v32 = vrot.slane %v506_v25, 4  ;;  %v521_v33 = vsel %vm309_vm1, %v506_v25, %v520_v23  ;;  %v530_v34 = vrot.slane %v517_v26, 4  ;;  %v533_v35 = vsel %vm309_vm1, %v517_v26, %v532_v24 }
 0x1a8   : > { %v529_v36 = vperm.slane %v521_v33, %v1416_v19  ;;  %v541_v37 = vperm.slane %v533_v35, %v1416_v19  ;;  %v613_v43 = vperm.slane %v607_v39, %v1416_v19  ;;  %v618_v49 = vrot.slane %v601_v42, 4 }
 0x1a9   : > { %v519_v40 = vsel %vm309_vm1, %v518_v32, %v500_v11  ;;  %v531_v41 = vsel %vm309_vm1, %v530_v34, %v511_v14  ;;  %v620_v50 = vrot.slane %v605_v29, 4  ;;  %v624_v62 = vrot.slane %v617_v48, 4 }
 0x1aa   : > { %v525_v44 = vperm.slane %v519_v40, %v1416_v19  ;;  %v537_v45 = vperm.slane %v531_v41, %v1416_v19  ;;  %v546_v46 = vrot.slane %v541_v37, 4  ;;  %v548_v47 = vrot.slane %v529_v36, 4 }
 0x1ab   : > { %v622_v51 = vrot.slane %v613_v43, 4  ;;  %v621_v58 = vsel %vm309_vm1, 0.0, %v620_v50  ;;  %v619_v61 = vsel %vm309_vm1, 0.0, %v618_v49  ;;  %v626_v1 = vsel %vm309_vm1, %v620_v50, %v601_v42 }
 0x1ac   : > { %v542_v52 = vrot.slane %v537_v45, 4  ;;  %v544_v53 = vrot.slane %v525_v44, 4  ;;  %v547_v54 = vsel %vm309_vm1, %v546_v46, %v529_v36  ;;  %v549_v55 = vsel %vm309_vm1, %v541_v37, %v548_v47 }
 0x1ad   : > { %v552_v56 = vpack.c.bf16 %v547_v54, %v547_v54  ;;  %v553_v57 = vpack.c.bf16 %v549_v55, %v549_v55  ;;  %v631_v2 = vrot.slane %v621_v58, 4  ;;  %v623_v3 = vsel %vm309_vm1, 0.0, %v622_v51 }
 0x1ae   : > { %v543_v59 = vsel %vm309_vm1, %v542_v52, %v525_v44  ;;  %v545_v60 = vsel %vm309_vm1, %v537_v45, %v544_v53  ;;  %v625_v4 = vsel %vm309_vm1, 0.0, %v624_v62  ;;  %v630_v5 = vperm.slane %v626_v1, %v1411_v12 }
 0x1af   : > { %v550_v63 = vpack.c.bf16 %v543_v59, %v543_v59  ;;  %v551_v0 = vpack.c.bf16 %v545_v60, %v545_v60  ;;  %556 = vst.msk [vmem:[%s263_s6 + $0x8] sm:$0xf] %vm423_vm2, %v552_v56  ;;  %v637_v6 = vsel %vm309_vm1, %v624_v62, %v613_v43  ;;  %v632_v7 = vsel %vm309_vm1, %v631_v2, %v619_v61 }
 0x1b0   : > { %557 = vst.msk [vmem:[%s263_s6 + $0xc] sm:$0xf] %vm423_vm2, %v553_v57  ;;  %v641_v8 = vperm.slane %v637_v6, %v1411_v12  ;;  %v642_v9 = vrot.slane %v625_v4, 4  ;;  %v636_v10 = vperm.slane %v632_v7, %v1411_v12  ;;  %v650_v11 = vrot.slane %v630_v5, 4 }
 0x1b1   : > { %554 = vst.msk [vmem:[%s263_s6] sm:$0xf] %vm423_vm2, %v550_v63 }
 0x1b2   : > { %555 = vst.msk [vmem:[%s263_s6 + $0x4] sm:$0xf] %vm423_vm2, %v551_v0  ;;  %v643_v13 = vsel %vm309_vm1, %v642_v9, %v623_v3  ;;  %v662_v14 = vrot.slane %v641_v8, 4 }
 0x1b3   : > { %1173 = shalt.err (!%p1170_p9)
}
 0x1b4   : > { %952 = dma.vmem_to_hbm [thread:$0]  (%p1375_p4), %s731_s23, 256, %s733_s22, %s1566_s14, %s1661_s27, %s1661_s27, %s1276_s9   ;;  %v647_v15 = vperm.slane %v643_v13, %v1411_v12  ;;  %v648_v16 = vrot.slane %v636_v10, 4  ;;  %v651_v17 = vsel %vm309_vm1, %v636_v10, %v650_v11 }
 0x1b5   : > { %v659_v18 = vperm.slane %v651_v17, %v1416_v19  ;;  %s747_s29 = scalar_lea.hbm %s1650_s4, %s1464_s28  ;;  %s270_s23 = scalar_lea.vmem [#allocation10], %s1448_s26 }
 0x1b6   : > { %v649_v20 = vsel %vm309_vm1, %v648_v16, %v630_v5  ;;  %v660_v21 = vrot.slane %v647_v15, 4  ;;  %v663_v22 = vsel %vm309_vm1, %v647_v15, %v662_v14  ;;  %s1598_s6 = sshll.u32 %s747_s29, 4  ;;  %s748_s22 = sshll.u32 %s270_s23, 4  ;;  %s749_s22 = int_to_ptr.vmem [resolvable:$true] %s748_s22  ;;  %s751_s6 = int_to_ptr.hbm [resolvable:$true] %s1598_s6 }
 0x1b7   : > { %v655_v23 = vperm.slane %v649_v20, %v1416_v19  ;;  %v671_v24 = vperm.slane %v663_v22, %v1416_v19  ;;  %v678_v25 = vrot.slane %v659_v18, 4  ;;  %s1188_s28 = sshra.s32 %s751_s6, 4  ;;  %s1194_s13 = scalar_lea.hbm %s1650_s4, 32  ;;  %s1189_s28 = int_to_ptr.hbm [resolvable:$true] %s1188_s28 }
 0x1b8   : > { %v661_v26 = vsel %vm309_vm1, %v660_v21, %v641_v8  ;;  %s1190_s26 = scalar_lea.hbm %s1189_s28, 16  ;;  %p1195_p13 = scmp.lt.s32.totalorder %s1189_s28, %s1650_s4 }
 0x1b9   : > { %v667_v12 = vperm.slane %v661_v26, %v1416_v19  ;;  %v674_v27 = vrot.slane %v655_v23, 4  ;;  %v676_v28 = vrot.slane %v671_v24, 4  ;;  %v679_v29 = vsel %vm309_vm1, %v671_v24, %v678_v25  ;;  %p1191_p10 = scmp.ne.s32.totalorder %s1189_s28, %s1190_s26  ;;  %p1196_p0 = scmp.lt.s32.totalorder %s1194_s13, %s1190_s26 }
 0x1ba   : > { %v683_v30 = vpack.c.bf16 %v679_v29, %v679_v29 }
 0x1bb   : > { %v672_v31 = vrot.slane %v667_v12, 4  ;;  %v675_v32 = vsel %vm309_vm1, %v667_v12, %v674_v27  ;;  %v677_v33 = vsel %vm309_vm1, %v676_v28, %v659_v18  ;;  %p1192_p11 = pnand %p1191_p10, %p1375_p4  ;;  %p1197_p2 = por %p1196_p0, %p1195_p13 }
 0x1bc   : > { %v681_v34 = vpack.c.bf16 %v675_v32, %v675_v32  ;;  %v682_v35 = vpack.c.bf16 %v677_v33, %v677_v33  ;;  %687 = vst.msk [vmem:[%s270_s23 + $0xc] sm:$0xf] %vm423_vm2, %v683_v30 }
 0x1bd   : > { %v673_v19 = vsel %vm309_vm1, %v672_v31, %v655_v23  ;;  %p1193_p12 = pneg %p1192_p11 }
 0x1be   : > { %v680_v36 = vpack.c.bf16 %v673_v19, %v673_v19  ;;  %685 = vst.msk [vmem:[%s270_s23 + $0x4] sm:$0xf] %vm423_vm2, %v681_v34 }
 0x1bf   : > { %686 = vst.msk [vmem:[%s270_s23 + $0x8] sm:$0xf] %vm423_vm2, %v682_v35  ;;  %p1198_p5 = pnand %p1197_p2, %p1193_p12 }
 0x1c0   : > { %684 = vst.msk [vmem:[%s270_s23] sm:$0xf] %vm423_vm2, %v680_v36 }
 0x1c1   : > { %1201 = shalt.err (!%p1198_p5)
}
 0x1c2   : > { %953 = dma.vmem_to_hbm [thread:$0]  (%p1375_p4), %s749_s22, 256, %s751_s6, %s1566_s14, %s1661_s27, %s1661_s27, %s1276_s9  }
 0x1c3 PF: > { %s765_s0 = sand.u32 1, %s1244_s15   ;;  %p966_p8 = pnand %p916_p6, %p1383_p7 }
 0x1c4   : > { %s766_s30 = scalar_lea.sflag [#allocation4], %s765_s0 }
 0x1c5   : > { %p967_p1 = pneg %p966_p8 }
 0x1c7   : > { %1235 = dma.done.wait (%p967_p1), %s766_s30, 256  }
 0x1c8   : > { %1237 = vsyncadd (%p967_p1), %s766_s30, 4294967040  ;;  %s1662_s21 = sadd.s32 4294967294, %s1264_s20  }
 0x1c9   : > { %s775_s10 = sand.u32 1, %s1662_s21  }
 0x1ca   : > { %s776_s8 = scalar_lea.sflag [#allocation9], %s775_s10 }
 0x1cb   : > { %1239 = dma.done.wait (%p967_p1), %s776_s8, 512  }
 0x1cc   : > { %1241 = vsyncadd (%p967_p1), %s776_s8, 4294966784  ;;  %s25_s20 = sadd.s32 1, %s1264_s20   ;;  %s1663_s15 = smov %s1248_s16 }
 0x1cd   : > { %p22_p4 = scmp.ge.s32.totalorder %s25_s20, 4   ;;  %s1664_s16 = smov %s1252_s17 }
 0x1ce   : > { %s1665_s17 = smov %s1381_s11  ;;  %s1666_s18 = smov %s1260_s19 }
 0x1cf   : > { %s1667_s19 = smov %s1669_s5  ;;  %24 = sbr.rel (!%p22_p4) target bundleno = 11 (0xb), region = 109 }
 0x1d4   :  { %792 = vsyncpa [#allocation3], 1 }
 0x1d5   :  { %794 = vsyncpa [#allocation3 + $0x1], 1 }
 0x1d6   :  { %795 = vsyncpa [#allocation6], 1 }
 0x1d7   :  { %796 = vsyncpa [#allocation4], 1 }
 0x1d8   :  { %798 = vsyncpa [#allocation4 + $0x1], 1 }
 0x1d9   :  { %799 = vsyncpa [#allocation9], 1 }
 0x1da   :  { %801 = vsyncpa [#allocation9 + $0x1], 1 }

</bundles_post_ra>
